<compile_context>
chip_gen: v5e
topology: v5e:2x2
jax: 0.10.0
libtpu: 0.0.40
codegen_flags: <defaults>
</compile_context>

<pallas_src>
import functools

import jax
import jax.numpy as jnp
from jax.experimental import pallas as pl
from jax.experimental.pallas import tpu as pltpu

LANE = 128
_VMEM_LIMIT_BYTES = 32 * 1024 * 1024   # explicit scoped-VMEM limit (safe on v5e/v6e/v7x)
_VMEM_BUDGET_BYTES = 24 * 1024 * 1024  # per-step footprint target (headroom under the limit)


def _round_up(x, m):
    return (x + m - 1) // m * m


# ----------------------------------------------------------------------------
# Pallas kernel
# ----------------------------------------------------------------------------
def _critic_kernel(layer_meta, compute_dtype,
                   s_ref, a_ref, ws_ref, wa_ref, w_ref, b_ref, o_ref):
    """layer_meta: tuple of (k_offset, k_size, n_size) per post-encoder layer (static).

    s_ref  : [TB, state_dim]   batch tile of raw states  (no lane padding in HBM)
    a_ref  : [TB, action_dim]  batch tile of raw actions
    ws_ref : [state_dim,  N0]  state-encoder weights, placed in columns [0:H0)      (resident)
    wa_ref : [action_dim, N0]  action-encoder weights, placed in columns [H0:2*H0)  (resident)
    w_ref  : [K_total, N_max]  all folded post-encoder weights, stacked along K     (resident)
    b_ref  : [L_pad8, N_max]   fp32 biases: row 0 = encoder bias, rows 1.. = layers (resident)
    o_ref  : [TB, 1]           Q values (only the real column is written back)
    """
    n0 = ws_ref.shape[1]

    # Fused encoders: column-disjoint blocks, sum == concat([s@Ws, a@Wa], axis=1).
    z = jnp.dot(s_ref[...], ws_ref[...], preferred_element_type=jnp.float32)
    z = z + jnp.dot(a_ref[...], wa_ref[...], preferred_element_type=jnp.float32)
    z = z + b_ref[0:1, :n0]                                   # fp32 epilogue (v5e-safe)
    h = jnp.maximum(z, 0.0).astype(compute_dtype)

    last = len(layer_meta) - 1
    for li, (k_off, k_sz, n_sz) in enumerate(layer_meta):
        w = w_ref[k_off:k_off + k_sz, :n_sz]                  # 128-aligned static slice
        z = jnp.dot(h, w, preferred_element_type=jnp.float32)
        z = z + b_ref[li + 1:li + 2, :n_sz]
        if li != last:
            h = jnp.maximum(z, 0.0).astype(compute_dtype)
        else:
            o_ref[...] = z[:, :o_ref.shape[1]].astype(o_ref.dtype)


# ----------------------------------------------------------------------------
# Wrapper-side parameter folding + packing
# ----------------------------------------------------------------------------
def _fold_layers(params, state_dim, action_dim, hidden_dims):
    """Lay the encoders out against the concatenated feature axis and fold each eval-mode
    BN affine into the following Linear. Returns (Ws_cat, Wa_cat, b0, [(W, b), ...])."""
    p = list(params)
    H0 = hidden_dims[0]

    Ws, bs, ss, bis = p[0:4]
    Wa, ba, sa, bia = p[4:8]

    Ws_cat = jnp.zeros((state_dim, 2 * H0), jnp.float32).at[:, :H0].set(Ws)
    Wa_cat = jnp.zeros((action_dim, 2 * H0), jnp.float32).at[:, H0:].set(Wa)
    b0 = jnp.concatenate([bs, ba], axis=1)

    carry_s = jnp.concatenate([ss, sa], axis=1)   # BN affine of the (fused) encoder output
    carry_b = jnp.concatenate([bis, bia], axis=1)

    layers = []
    off = 8
    for i in range(len(hidden_dims) - 1):
        W, b, s, bi = p[off + 4 * i: off + 4 * i + 4]
        layers.append((W * carry_s.reshape(-1, 1), carry_b @ W + b))
        carry_s, carry_b = s, bi

    W_out, b_out = p[-2], p[-1]
    layers.append((W_out * carry_s.reshape(-1, 1), carry_b @ W_out + b_out))
    return Ws_cat, Wa_cat, b0, layers


def pack_critic_params(params, state_dim, action_dim, hidden_dims,
                       compute_dtype=jnp.bfloat16):
    """Pack encoder weights as two narrow blocks and all post-encoder layers into one
    128-aligned weight slab + one fp32 bias slab."""
    Ws_cat, Wa_cat, b0, layers = _fold_layers(params, state_dim, action_dim, hidden_dims)

    n0 = Ws_cat.shape[1]                     # 2 * hidden_dims[0]
    n0_pad = _round_up(n0, LANE)
    n_pads = [_round_up(W.shape[1], LANE) for W, _ in layers]
    n_max = max([n0_pad] + n_pads)

    ws_pack = jnp.zeros((state_dim, n0_pad), jnp.float32).at[:, :n0].set(Ws_cat)
    wa_pack = jnp.zeros((action_dim, n0_pad), jnp.float32).at[:, :n0].set(Wa_cat)

    k_pads = [n0_pad] + n_pads[:-1]          # each layer consumes the previous padded width
    w_blocks, meta = [], []
    b_rows = [jnp.zeros((1, n_max), jnp.float32).at[:, :n0].set(b0)]
    k_off = 0
    for (W, b), kp, npad in zip(layers, k_pads, n_pads):
        Wp = jnp.zeros((kp, n_max), jnp.float32).at[:W.shape[0], :W.shape[1]].set(W)
        w_blocks.append(Wp)
        b_rows.append(jnp.zeros((1, n_max), jnp.float32).at[:, :b.shape[1]].set(b))
        meta.append((k_off, kp, npad))
        k_off += kp

    w_slab = jnp.concatenate(w_blocks, axis=0).astype(compute_dtype)
    b_stack = jnp.concatenate(b_rows, axis=0)
    l_pad = _round_up(b_stack.shape[0], 8)
    b_slab = jnp.zeros((l_pad, n_max), jnp.float32).at[:b_stack.shape[0]].set(b_stack)

    return (ws_pack.astype(compute_dtype), wa_pack.astype(compute_dtype),
            w_slab, b_slab, tuple(meta))


# ----------------------------------------------------------------------------
# Batch-tile sizing (VMEM budget + megacore occupancy)
# ----------------------------------------------------------------------------
def _tile_vmem_bytes(tb, n_max, itemsize, weight_bytes):
    in_bytes = 2 * 2 * tb * LANE * itemsize   # 2 inputs x 2 pipeline buffers, lane-padded
    out_bytes = 2 * tb * LANE * 4             # output tile, lane-padded, double-buffered
    act_bytes = 3 * tb * n_max * 4            # live fp32 activation slabs inside the body
    return in_bytes + out_bytes + act_bytes + 2 * weight_bytes


def _pick_batch_tile(B, n_max, itemsize, weight_bytes, batch_tile):
    if B <= 8:
        return B                               # block == full batch dim (always legal)
    # Keep >= 2 grid steps whenever B allows it so v7x's two TensorCores both get work.
    tb = min(batch_tile, _round_up((B + 1) // 2, 8))
    tb = max(tb, 8)
    # Shrink until the per-step footprint fits the budget (valid on v5e/v6e/v7x).
    while tb > 8 and _tile_vmem_bytes(tb, n_max, itemsize, weight_bytes) > _VMEM_BUDGET_BYTES:
        tb = max(8, _round_up(tb // 2, 8))
    return tb


# ----------------------------------------------------------------------------
# Forward pass
# ----------------------------------------------------------------------------
def critic_forward(state, action, packed, batch_tile=4096):
    ws_pack, wa_pack, w_slab, b_slab, layer_meta = packed
    compute_dtype = w_slab.dtype

    B, state_dim = state.shape
    action_dim = action.shape[1]
    state = state.astype(compute_dtype)
    action = action.astype(compute_dtype)

    n_max = w_slab.shape[1]
    itemsize = jnp.dtype(compute_dtype).itemsize
    weight_bytes = (ws_pack.size + wa_pack.size + w_slab.size) * itemsize + b_slab.size * 4
    TB = _pick_batch_tile(B, n_max, itemsize, weight_bytes, batch_tile)

    grid = (pl.cdiv(B, TB),)                  # no batch padding: edge block is partial/masked
    kernel = functools.partial(_critic_kernel, layer_meta, compute_dtype)

    out = pl.pallas_call(
        kernel,
        out_shape=jax.ShapeDtypeStruct((B, 1), jnp.float32),
        grid_spec=pltpu.PrefetchScalarGridSpec(
            num_scalar_prefetch=0,
            grid=grid,
            in_specs=[
                pl.BlockSpec((TB, state_dim), lambda i: (i, 0)),    # narrow, full last dim
                pl.BlockSpec((TB, action_dim), lambda i: (i, 0)),   # narrow, full last dim
                pl.BlockSpec(ws_pack.shape, lambda i: (0, 0)),      # resident weights
                pl.BlockSpec(wa_pack.shape, lambda i: (0, 0)),
                pl.BlockSpec(w_slab.shape, lambda i: (0, 0)),
                pl.BlockSpec(b_slab.shape, lambda i: (0, 0)),
            ],
            out_specs=pl.BlockSpec((TB, 1), lambda i: (i, 0)),      # only the real Q column
        ),
        compiler_params=pltpu.CompilerParams(
            dimension_semantics=("parallel",),
            vmem_limit_bytes=_VMEM_LIMIT_BYTES,
        ),
    )(state, action, ws_pack, wa_pack, w_slab, b_slab)

    return out


# ----------------------------------------------------------------------------
# Deterministic parameter construction (mimics module __init__ shapes)
# ----------------------------------------------------------------------------
def make_params(key, state_dim, action_dim, hidden_dims):
    eps = 1e-5

    def linear(key, fan_in, fan_out):
        k1, k2 = jax.random.split(key)
        bound = 1.0 / jnp.sqrt(fan_in)
        w = jax.random.uniform(k1, (fan_in, fan_out), jnp.float32, -bound, bound)
        b = jax.random.uniform(k2, (1, fan_out), jnp.float32, -bound, bound)
        return w, b

    def bn_folded(key, dim):
        k1, k2, k3 = jax.random.split(key, 3)
        gamma = 1.0 + 0.1 * jax.random.normal(k1, (1, dim), jnp.float32)
        beta = 0.1 * jax.random.normal(k2, (1, dim), jnp.float32)
        running_mean = 0.05 * jax.random.normal(k3, (1, dim), jnp.float32)
        running_var = jnp.ones((1, dim), jnp.float32)
        scale = gamma / jnp.sqrt(running_var + eps)
        bias = beta - running_mean * scale
        return scale, bias

    keys = jax.random.split(key, 4 + 2 * len(hidden_dims))
    ki = iter(keys)

    params = []
    w, b = linear(next(ki), state_dim, hidden_dims[0])
    s, bi = bn_folded(next(ki), hidden_dims[0])
    params += [w, b, s, bi]
    w, b = linear(next(ki), action_dim, hidden_dims[0])
    s, bi = bn_folded(next(ki), hidden_dims[0])
    params += [w, b, s, bi]
    prev = hidden_dims[0] * 2
    for hd in hidden_dims[1:]:
        w, b = linear(next(ki), prev, hd)
        s, bi = bn_folded(next(ki), hd)
        params += [w, b, s, bi]
        prev = hd
    w, b = linear(next(ki), prev, 1)
    params += [w, b]
    return params


# ----------------------------------------------------------------------------
# Pure-JAX reference: ORIGINAL (unfolded, unfused) eval-mode semantics
# ----------------------------------------------------------------------------
def critic_reference(state, action, params, hidden_dims):
    p = list(params)

    def lin_relu_bn(x, w, b, s, bi):
        return jnp.maximum(x @ w + b, 0.0) * s + bi

    sf = lin_relu_bn(state, p[0], p[1], p[2], p[3])
    af = lin_relu_bn(action, p[4], p[5], p[6], p[7])
    h = jnp.concatenate([sf, af], axis=1)
    off = 8
    for i in range(len(hidden_dims) - 1):
        w, b, s, bi = p[off + 4 * i: off + 4 * i + 4]
        h = lin_relu_bn(h, w, b, s, bi)
    return h @ p[-2] + p[-1]


# ----------------------------------------------------------------------------
if __name__ == "__main__":
    state_dim, action_dim = 16, 8
    hidden_dims = [32, 32]

    key = jax.random.PRNGKey(0)
    k_data, k_params = jax.random.split(key)
    params = make_params(k_params, state_dim, action_dim, hidden_dims)

    packed_f32 = pack_critic_params(params, state_dim, action_dim, hidden_dims,
                                    compute_dtype=jnp.float32)
    packed_bf16 = pack_critic_params(params, state_dim, action_dim, hidden_dims)  # bf16 default

    # B=8: single grid step.  B=50: multi-step grid with a partial (masked) edge block.
    for B in (8, 50):
        ks, ka = jax.random.split(jax.random.fold_in(k_data, B))
        state = jax.random.normal(ks, (B, state_dim), jnp.float32)
        action = jax.random.normal(ka, (B, action_dim), jnp.float32)

        q_ref = critic_reference(state, action, params, hidden_dims)

        # fp32 path: must match the unfolded reference tightly.
        q = jax.block_until_ready(critic_forward(state, action, packed_f32))
        assert q.shape == (B, 1)
        assert jnp.allclose(q, q_ref, atol=1e-4, rtol=1e-4), "fp32 mismatch vs JAX reference"

        # bf16 default path: fp32 accumulate + fp32 epilogue, looser tolerance.
        q16 = jax.block_until_ready(critic_forward(state, action, packed_bf16))
        assert q16.shape == (B, 1)
        assert bool(jnp.all(jnp.isfinite(q16)))
        assert jnp.allclose(q16, q_ref, atol=0.1, rtol=0.1), "bf16 mismatch vs JAX reference"

    print("KERNEL_OK")
</pallas_src>

<mosaic_0001>
module attributes {stable_mosaic.version = 11 : i64} {
  func.func @_critic_kernel(%arg0: i32, %arg1: memref<8x16xf32, #tpu.memory_space<vmem>>, %arg2: memref<8x8xf32, #tpu.memory_space<vmem>>, %arg3: memref<16x128xf32, #tpu.memory_space<vmem>>, %arg4: memref<8x128xf32, #tpu.memory_space<vmem>>, %arg5: memref<256x128xf32, #tpu.memory_space<vmem>>, %arg6: memref<8x128xf32, #tpu.memory_space<vmem>>, %arg7: memref<8x1xf32, #tpu.memory_space<vmem>>) attributes {dimension_semantics = [#tpu.dimension_semantics<parallel>], iteration_bounds = array<i64: 1>, scalar_prefetch = 0 : i64, scratch_operands = 0 : i64, tpu.core_type = #tpu.core_type<tc>, window_params = [{transform_indices = @transform_0, window_bounds = array<i64: 8, 16>}, {transform_indices = @transform_1, window_bounds = array<i64: 8, 8>}, {pipeline_mode = #tpu.pipeline_mode<synchronous>, transform_indices = @transform_2, window_bounds = array<i64: 16, 128>}, {pipeline_mode = #tpu.pipeline_mode<synchronous>, transform_indices = @transform_3, window_bounds = array<i64: 8, 128>}, {pipeline_mode = #tpu.pipeline_mode<synchronous>, transform_indices = @transform_4, window_bounds = array<i64: 256, 128>}, {pipeline_mode = #tpu.pipeline_mode<synchronous>, transform_indices = @transform_5, window_bounds = array<i64: 8, 128>}, {transform_indices = @transform_6, window_bounds = array<i64: 8, 1>}]} {
    %c0 = arith.constant 0 : index
    %c0_0 = arith.constant 0 : index
    %0 = vector.load %arg1[%c0, %c0_0] : memref<8x16xf32, #tpu.memory_space<vmem>>, vector<8x16xf32>
    %c0_1 = arith.constant 0 : index
    %c0_2 = arith.constant 0 : index
    %1 = vector.load %arg3[%c0_1, %c0_2] : memref<16x128xf32, #tpu.memory_space<vmem>>, vector<16x128xf32>
    %cst = arith.constant dense<0.000000e+00> : vector<8x128xf32>
    %2 = tpu.matmul %0, %1, %cst {dimension_numbers = #tpu.dot_dimension_numbers<[1], [0], [0], [1], [0, 0, 1, 1], [], []>} : vector<8x16xf32>, vector<16x128xf32>, vector<8x128xf32> -> vector<8x128xf32>
    %c0_3 = arith.constant 0 : index
    %c0_4 = arith.constant 0 : index
    %3 = vector.load %arg2[%c0_3, %c0_4] : memref<8x8xf32, #tpu.memory_space<vmem>>, vector<8x8xf32>
    %c0_5 = arith.constant 0 : index
    %c0_6 = arith.constant 0 : index
    %4 = vector.load %arg4[%c0_5, %c0_6] : memref<8x128xf32, #tpu.memory_space<vmem>>, vector<8x128xf32>
    %cst_7 = arith.constant dense<0.000000e+00> : vector<8x128xf32>
    %5 = tpu.matmul %3, %4, %cst_7 {dimension_numbers = #tpu.dot_dimension_numbers<[1], [0], [0], [1], [0, 0, 1, 1], [], []>} : vector<8x8xf32>, vector<8x128xf32>, vector<8x128xf32> -> vector<8x128xf32>
    %6 = arith.addf %2, %5 : vector<8x128xf32>
    %c0_8 = arith.constant 0 : index
    %c0_9 = arith.constant 0 : index
    %7 = vector.load %arg6[%c0_8, %c0_9] : memref<8x128xf32, #tpu.memory_space<vmem>>, vector<1x128xf32>
    %8 = vector.broadcast %7 : vector<1x128xf32> to vector<8x128xf32>
    %9 = arith.addf %6, %8 : vector<8x128xf32>
    %cst_10 = arith.constant 0.000000e+00 : f32
    %10 = vector.broadcast %cst_10 : f32 to vector<8x128xf32>
    %11 = arith.maximumf %9, %10 : vector<8x128xf32>
    %c0_11 = arith.constant 0 : index
    %c0_12 = arith.constant 0 : index
    %12 = vector.load %arg5[%c0_11, %c0_12] : memref<256x128xf32, #tpu.memory_space<vmem>>, vector<128x128xf32>
    %cst_13 = arith.constant dense<0.000000e+00> : vector<8x128xf32>
    %13 = tpu.matmul %11, %12, %cst_13 {dimension_numbers = #tpu.dot_dimension_numbers<[1], [0], [0], [1], [0, 0, 1, 1], [], []>} : vector<8x128xf32>, vector<128x128xf32>, vector<8x128xf32> -> vector<8x128xf32>
    %c1 = arith.constant 1 : index
    %c0_14 = arith.constant 0 : index
    %14 = vector.load %arg6[%c1, %c0_14] : memref<8x128xf32, #tpu.memory_space<vmem>>, vector<1x128xf32>
    %15 = vector.broadcast %14 : vector<1x128xf32> to vector<8x128xf32>
    %16 = arith.addf %13, %15 : vector<8x128xf32>
    %cst_15 = arith.constant 0.000000e+00 : f32
    %17 = vector.broadcast %cst_15 : f32 to vector<8x128xf32>
    %18 = arith.maximumf %16, %17 : vector<8x128xf32>
    %c128 = arith.constant 128 : index
    %c0_16 = arith.constant 0 : index
    %19 = vector.load %arg5[%c128, %c0_16] : memref<256x128xf32, #tpu.memory_space<vmem>>, vector<128x128xf32>
    %cst_17 = arith.constant dense<0.000000e+00> : vector<8x128xf32>
    %20 = tpu.matmul %18, %19, %cst_17 {dimension_numbers = #tpu.dot_dimension_numbers<[1], [0], [0], [1], [0, 0, 1, 1], [], []>} : vector<8x128xf32>, vector<128x128xf32>, vector<8x128xf32> -> vector<8x128xf32>
    %c2 = arith.constant 2 : index
    %c0_18 = arith.constant 0 : index
    %21 = vector.load %arg6[%c2, %c0_18] : memref<8x128xf32, #tpu.memory_space<vmem>>, vector<1x128xf32>
    %22 = vector.broadcast %21 : vector<1x128xf32> to vector<8x128xf32>
    %23 = arith.addf %20, %22 : vector<8x128xf32>
    %24 = vector.extract_strided_slice %23 {offsets = [0, 0], sizes = [8, 1], strides = [1, 1]} : vector<8x128xf32> to vector<8x1xf32>
    %c0_19 = arith.constant 0 : index
    %c0_20 = arith.constant 0 : index
    %25 = vector.load %arg7[%c0_19, %c0_20] : memref<8x1xf32, #tpu.memory_space<vmem>>, vector<8x1xf32>
    tpu.vector_store %arg7[%c0_19, %c0_20], %24 {strides = array<i32>} : memref<8x1xf32, #tpu.memory_space<vmem>>, vector<8x1xf32>,
    return
  }
  func.func @transform_0(%arg0: i32) -> (i32, i32) {
    %c0_i32 = arith.constant 0 : i32
    %c0_i32_0 = arith.constant 0 : i32
    return %arg0, %c0_i32 : i32, i32
  }
  func.func @transform_1(%arg0: i32) -> (i32, i32) {
    %c0_i32 = arith.constant 0 : i32
    %c0_i32_0 = arith.constant 0 : i32
    return %arg0, %c0_i32 : i32, i32
  }
  func.func @transform_2(%arg0: i32) -> (i32, i32) {
    %c0_i32 = arith.constant 0 : i32
    %c0_i32_0 = arith.constant 0 : i32
    %c0_i32_1 = arith.constant 0 : i32
    return %c0_i32, %c0_i32_0 : i32, i32
  }
  func.func @transform_3(%arg0: i32) -> (i32, i32) {
    %c0_i32 = arith.constant 0 : i32
    %c0_i32_0 = arith.constant 0 : i32
    %c0_i32_1 = arith.constant 0 : i32
    return %c0_i32, %c0_i32_0 : i32, i32
  }
  func.func @transform_4(%arg0: i32) -> (i32, i32) {
    %c0_i32 = arith.constant 0 : i32
    %c0_i32_0 = arith.constant 0 : i32
    %c0_i32_1 = arith.constant 0 : i32
    return %c0_i32, %c0_i32_0 : i32, i32
  }
  func.func @transform_5(%arg0: i32) -> (i32, i32) {
    %c0_i32 = arith.constant 0 : i32
    %c0_i32_0 = arith.constant 0 : i32
    %c0_i32_1 = arith.constant 0 : i32
    return %c0_i32, %c0_i32_0 : i32, i32
  }
  func.func @transform_6(%arg0: i32) -> (i32, i32) {
    %c0_i32 = arith.constant 0 : i32
    %c0_i32_0 = arith.constant 0 : i32
    return %arg0, %c0_i32 : i32, i32
  }
}

</mosaic_0001>

<bundles_post_ra>
// kernel: tpu_custom_call.1
= control target key start
LH: loop header
LB: loop body
LE: loop exit
PB: predicated region body
PF: predicated region fallthrough
CT: control target
= control target key end

     0   :  { %11 = vsyncpa [#allocation3], 0  ;;  %s482_s0 = inlined_call_operand.hbm [shape: f32[8,16], index: 0, kind: input, shape index: {}]   ;;  %s483_s1 = inlined_call_operand.hbm [shape: f32[8,8], index: 1, kind: input, shape index: {}]   ;;  %s484_s2 = inlined_call_operand.hbm [shape: f32[16,128], index: 2, kind: input, shape index: {}]   ;;  %s485_s3 = inlined_call_operand.hbm [shape: f32[8,128], index: 3, kind: input, shape index: {}]   ;;  %s486_s4 = inlined_call_operand.hbm [shape: f32[256,128], index: 4, kind: input, shape index: {}]   ;;  %s487_s5 = inlined_call_operand.hbm [shape: f32[8,128], index: 5, kind: input, shape index: {}]   ;;  %s488_s6 = inlined_call_operand.vmem [shape: f32[8,1], index: 6, kind: output, shape index: {}]  }
   0x1   :  { %12 = vsyncpa [#allocation5], 0 }
   0x2   :  { %13 = vsyncpa [#allocation8], 0  ;;  %s31_s23 = sshll.u32 %s483_s1, 4  ;;  %s32_s23 = int_to_ptr.hbm [resolvable:$true] %s31_s23 }
   0x3   :  { %14 = vsyncpa [#allocation11], 0  ;;  %s418_s24 = smov [#allocation4]   ;;  %s55_s28 = sshll.u32 %s485_s3, 4  ;;  %s56_s28 = int_to_ptr.hbm [resolvable:$true] %s55_s28 }
   0x4   :  { %s33_s25 = sshll.u32 %s418_s24, 4  ;;  %s419_s29 = smov [#allocation7]   ;;  %s34_s25 = int_to_ptr.vmem [resolvable:$true] %s33_s25 }
   0x5   :  { %36 = dma.hbm_to_vmem [thread:$0]  %s32_s23, 128, %s34_s25, [#allocation5]  }
   0x6   :  { %s57_s30 = sshll.u32 %s419_s29, 4  ;;  %s20_s9 = sshll.u32 %s482_s0, 4  ;;  %s58_s30 = int_to_ptr.vmem [resolvable:$true] %s57_s30  ;;  %s21_s9 = int_to_ptr.hbm [resolvable:$true] %s20_s9 }
   0x7   :  { %60 = dma.hbm_to_vmem [thread:$0]  %s56_s28, 128, %s58_s30, [#allocation8]  }
   0x8   :  { %s41_s11 = sshll.u32 %s484_s2, 4  ;;  %s420_s12 = smov [#allocation2]   ;;  %s42_s11 = int_to_ptr.hbm [resolvable:$true] %s41_s11 }
   0x9   :  { %s22_s13 = sshll.u32 %s420_s12, 4  ;;  %s421_s3 = smov [#allocation6]   ;;  %s23_s13 = int_to_ptr.vmem [resolvable:$true] %s22_s13 }
   0xa   :  { %25 = dma.hbm_to_vmem [thread:$0]  %s21_s9, 128, %s23_s13, [#allocation3]  }
   0xb   :  { %s43_s14 = sshll.u32 %s421_s3, 4  ;;  %s422_s15 = smov 128   ;;  %s44_s14 = int_to_ptr.vmem [resolvable:$true] %s43_s14 }
   0xc   :  { %s423_s16 = smov 8   ;;  %s65_s18 = sshll.u32 %s486_s4, 4  ;;  %s66_s18 = int_to_ptr.hbm [resolvable:$true] %s65_s18 }
   0xd   :  { %49 = dma.hbm_to_vmem [thread:$0]  %s42_s11, 256, %s44_s14, [#allocation5], %s422_s15, %s422_s15, %s423_s16  }
   0xe   :  { %s424_s19 = smov [#allocation9]   ;;  %s79_s22 = sshll.u32 %s487_s5, 4  ;;  %s80_s22 = int_to_ptr.hbm [resolvable:$true] %s79_s22 }
   0xf   :  { %s67_s20 = sshll.u32 %s424_s19, 4  ;;  %s425_s23 = smov [#allocation10]   ;;  %s68_s20 = int_to_ptr.vmem [resolvable:$true] %s67_s20 }
  0x10   :  { %73 = dma.hbm_to_vmem [thread:$0]  %s66_s18, 4096, %s68_s20, [#allocation8], %s422_s15, %s422_s15, %s423_s16  }
  0x11   :  { %s81_s24 = sshll.u32 %s425_s23, 4  ;;  %s82_s24 = int_to_ptr.vmem [resolvable:$true] %s81_s24 }
  0x12   :  { %84 = dma.hbm_to_vmem [thread:$0]  %s80_s22, 128, %s82_s24, [#allocation11]  }
  0x13   :  { %410 = dma.done.wait [#allocation3], 128  }
  0x14   :  { %411 = vsyncadd [#allocation3], 4294967168 }
  0x15   :  { %412 = dma.done.wait [#allocation5], 384  }
  0x16   :  { %413 = vsyncadd [#allocation5], 4294966912 }
  0x17   :  { %414 = dma.done.wait [#allocation8], 4224  }
  0x18   :  { %415 = vsyncadd [#allocation8], 4294963072 }
  0x19   :  { %416 = dma.done.wait [#allocation11], 128  }
  0x1a   :  { %417 = vsyncadd [#allocation11], 4294967168  ;;  %vm114_vm0 = vcmask 64512   ;;  %v111_v0 = vld [vmem:[#allocation6 + $0x8] sm:$0xff]  ;;  %v113_v1 = vld [vmem:[#allocation7] sm:$0xff]  ;;  %vm138_vm1 = vcmask 130048  }
  0x1b   :  { %v110_v2 = vld [vmem:[#allocation6] sm:$0xff]  ;;  %156 = vmatpush.msra.mxu1 %v111_v0  ;;  %133 = vmatpush.msra.mxu0 %v113_v1  ;;  %v112_v3 = vld [vmem:[#allocation4] sm:$0xff]  ;;  %v109_v4 = vld [vmem:[#allocation2] sm:$0xff]  ;;  %vm243_vm2 = vcmask 7168  }
  0x1c   :  { %v181_v5 = vld [vmem:[#allocation9 + $0x78] sm:$0xff]  ;;  %253 = vmatmul.msk.f32.vlgmr.msra.gmra.mxu0 %vm114_vm0, %v112_v3  ;;  %v180_v6 = vld [vmem:[#allocation9 + $0x70] sm:$0xff]  ;;  %v179_v7 = vld [vmem:[#allocation9 + $0x68] sm:$0xff] }
  0x1d   :  { %184 = vmatpush.msra.mxu2 %v181_v5  ;;  %157 = vmatpush.msra.mxu1 %v110_v2  ;;  %v178_v8 = vld [vmem:[#allocation9 + $0x60] sm:$0xff]  ;;  %v177_v9 = vld [vmem:[#allocation9 + $0x58] sm:$0xff]  ;;  %v176_v10 = vld [vmem:[#allocation9 + $0x50] sm:$0xff] }
  0x1e   :  { %254 = vmatmul.msk.f32.vlgmr.msra.gmra.mxu1 %vm138_vm1, %v109_v4  ;;  %v175_v11 = vld [vmem:[#allocation9 + $0x48] sm:$0xff]  ;;  %v174_v12 = vld [vmem:[#allocation9 + $0x40] sm:$0xff]  ;;  %v173_v13 = vld [vmem:[#allocation9 + $0x38] sm:$0xff] }
  0x1f   :  { %185 = vmatpush.msra.mxu2 %v180_v6  ;;  %v172_v14 = vld [vmem:[#allocation9 + $0x30] sm:$0xff]  ;;  %v171_v15 = vld [vmem:[#allocation9 + $0x28] sm:$0xff]  ;;  %v170_v16 = vld [vmem:[#allocation9 + $0x20] sm:$0xff] }
  0x20   :  { %v169_v17 = vld [vmem:[#allocation9 + $0x18] sm:$0xff]  ;;  %v168_v18 = vld [vmem:[#allocation9 + $0x10] sm:$0xff]  ;;  %v167_v19 = vld [vmem:[#allocation9 + $0x8] sm:$0xff] }
  0x21   :  { %186 = vmatpush.msra.mxu2 %v179_v7  ;;  %v166_v20 = vld [vmem:[#allocation9] sm:$0xff]  ;;  %v220_v21 = vld [vmem:[#allocation9 + $0xf8] sm:$0xff]  ;;  %v219_v22 = vld [vmem:[#allocation9 + $0xf0] sm:$0xff] }
  0x22   :  { %223 = vmatpush.msra.mxu3 %v220_v21  ;;  %v218_v23 = vld [vmem:[#allocation9 + $0xe8] sm:$0xff]  ;;  %v217_v24 = vld [vmem:[#allocation9 + $0xe0] sm:$0xff]  ;;  %v216_v25 = vld [vmem:[#allocation9 + $0xd8] sm:$0xff] }
  0x23   :  { %187 = vmatpush.msra.mxu2 %v178_v8  ;;  %v215_v26 = vld [vmem:[#allocation9 + $0xd0] sm:$0xff]  ;;  %v214_v27 = vld [vmem:[#allocation9 + $0xc8] sm:$0xff]  ;;  %v213_v28 = vld [vmem:[#allocation9 + $0xc0] sm:$0xff] }
  0x24   :  { %224 = vmatpush.msra.mxu3 %v219_v22  ;;  %v212_v29 = vld [vmem:[#allocation9 + $0xb8] sm:$0xff]  ;;  %v211_v30 = vld [vmem:[#allocation9 + $0xb0] sm:$0xff]  ;;  %v210_v31 = vld [vmem:[#allocation9 + $0xa8] sm:$0xff] }
  0x25   :  { %188 = vmatpush.msra.mxu2 %v177_v9  ;;  %v209_v32 = vld [vmem:[#allocation9 + $0xa0] sm:$0xff]  ;;  %v208_v33 = vld [vmem:[#allocation9 + $0x98] sm:$0xff]  ;;  %v207_v40 = vld [vmem:[#allocation9 + $0x90] sm:$0xff] }
  0x26   :  { %225 = vmatpush.msra.mxu3 %v218_v23  ;;  %v263_v35 = vld [vmem:[#allocation10] ss:$0 sm:$0xff]  ;;  %v206_v41 = vld [vmem:[#allocation9 + $0x88] sm:$0xff]  ;;  %v264_v43 = vld [vmem:[#allocation10 + $0x1] ss:$0 sm:$0xff] }
  0x27   :  { %189 = vmatpush.msra.mxu2 %v176_v10  ;;  %v205_v42 = vld [vmem:[#allocation9 + $0x80] sm:$0xff] }
  0x28   :  { %226 = vmatpush.msra.mxu3 %v217_v24  ;;  %v265_v47 = vld [vmem:[#allocation10 + $0x2] ss:$0 sm:$0xff] }
  0x29   :  { %190 = vmatpush.msra.mxu2 %v175_v11 }
  0x2a   :  { %227 = vmatpush.msra.mxu3 %v216_v25 }
  0x2b   :  { %191 = vmatpush.msra.mxu2 %v174_v12 }
  0x2c   :  { %228 = vmatpush.msra.mxu3 %v215_v26 }
  0x2d   :  { %192 = vmatpush.msra.mxu2 %v173_v13 }
  0x2e   :  { %229 = vmatpush.msra.mxu3 %v214_v27 }
  0x2f   :  { %193 = vmatpush.msra.mxu2 %v172_v14 }
  0x30   :  { %230 = vmatpush.msra.mxu3 %v213_v28 }
  0x31   :  { %194 = vmatpush.msra.mxu2 %v171_v15 }
  0x32   :  { %231 = vmatpush.msra.mxu3 %v212_v29 }
  0x33   :  { %195 = vmatpush.msra.mxu2 %v170_v16 }
  0x34   :  { %232 = vmatpush.msra.mxu3 %v211_v30 }
  0x35   :  { %196 = vmatpush.msra.mxu2 %v169_v17 }
  0x36   :  { %233 = vmatpush.msra.mxu3 %v210_v31 }
  0x37   :  { %197 = vmatpush.msra.mxu2 %v168_v18 }
  0x38   :  { %234 = vmatpush.msra.mxu3 %v209_v32 }
  0x39   :  { %198 = vmatpush.msra.mxu2 %v167_v19 }
  0x3a   :  { %235 = vmatpush.msra.mxu3 %v208_v33 }
  0x3b   :  { %199 = vmatpush.msra.mxu2 %v166_v20 }
  0x3c   :  { %236 = vmatpush.msra.mxu3 %v207_v40 }
  0x3e   :  { %237 = vmatpush.msra.mxu3 %v206_v41 }
  0x40   :  { %238 = vmatpush.msra.mxu3 %v205_v42 }
  0x99   :  { %v135_v34 = vpop.f32.mrf.mxu0 }
  0x9b   :  { %v159_v36 = vpop.f32.mrf.mxu1 }
  0x9c   :  { %v160_v37 = vadd.f32 %v159_v36, %v135_v34 }
  0x9e   :  { %v164_v38 = vadd.f32 %v263_v35, %v160_v37 }
  0xa0   :  { %v165_v39 = vmax.f32 %v164_v38, 0.0 }
  0xa2   :  { %200 = vmatmul.f32.vlgmr.msra.gmra.mxu2 %v165_v39 }
 0x125   :  { %v201_v44 = vpop.f32.mrf.mxu2 }
 0x126   :  { %v202_v45 = vadd.f32 %v264_v43, %v201_v44 }
 0x128   :  { %v204_v46 = vmax.f32 %v202_v45, 0.0 }
 0x12a   :  { %239 = vmatmul.f32.vlgmr.msra.gmra.mxu3 %v204_v46 }
 0x1ad   :  { %v240_v48 = vpop.f32.mrf.mxu3 }
 0x1ae   :  { %v241_v49 = vadd.f32 %v265_v47, %v240_v48 }
 0x1b0   :  { %244 = vst.msk [vmem:[%s488_s6] sm:$0xff] %vm243_vm2, %v241_v49 }
 0x1b1   :  { %249 = vsyncpa [#allocation3], 1 }
 0x1b2   :  { %250 = vsyncpa [#allocation5], 1 }
 0x1b3   :  { %251 = vsyncpa [#allocation8], 1 }
 0x1b4   :  { %252 = vsyncpa [#allocation11], 1 }

</bundles_post_ra>
